<compile_context>
chip_gen: v7x
topology: tpu7x:2x2x1
jax: 0.10.0
libtpu: 0.0.40
codegen_flags: <defaults>
</compile_context>

<pallas_src>
import functools

import jax
import jax.numpy as jnp
import numpy as np
from jax import lax
from jax.experimental import pallas as pl
from jax.experimental.pallas import tpu as pltpu


def _round_up(x, m):
    return ((x + m - 1) // m) * m


def _cost_kernel(cc_ref, masks_ref, tgt_ref, tsum_ref, c_ref,
                 md_ref, sd_ref, spsum_ref, sgsum_ref,
                 *, num_points, tile_p, mask_tail):
    """Grid = (batch, P tiles).  All arrays keep their native layouts.

       Blocks:
         cc    [1, 1, Q]       f32  (precomputed -softmax(logits)[:, 0])
         masks [1, tile_p, Q]  f32  (native [B, P, Q]; P on sublanes, Q on lanes)
         tgt   [1, tile_p, T]  f32  (native [B, P, T])
         tsum  [1, T, 1]       f32  (precomputed colsum over P of targets)
         out   [1, T, Q]       f32  (C^T; transposed to [Q, T] in the wrapper)
       Scratch (f32): md [T,Q] = T^t m, sd [T,Q] = T^t sigmoid(m),
                      spsum [1,Q] = rowsum(softplus(m)), sgsum [1,Q] = rowsum(sigmoid(m))."""
    k = pl.program_id(1)

    @pl.when(k == 0)
    def _init():
        md_ref[...] = jnp.zeros_like(md_ref)
        sd_ref[...] = jnp.zeros_like(sd_ref)
        spsum_ref[...] = jnp.zeros_like(spsum_ref)
        sgsum_ref[...] = jnp.zeros_like(sgsum_ref)

    m = masks_ref[0]                                      # [tile_p, Q] f32
    t = tgt_ref[0]                                        # [tile_p, T] f32

    if mask_tail:
        # Partial trailing tile: OOB rows of the block hold unspecified data -> neutralize
        # them before any math (softplus(-30) ~ 0, sigmoid(-30) ~ 0, zero targets add 0).
        rem = num_points - k * tile_p
        pid = lax.broadcasted_iota(jnp.int32, (tile_p, 1), 0)
        valid = pid < rem
        m = jnp.where(valid, m, -30.0)
        t = jnp.where(valid, t, 0.0)

    # Shared-exponential softplus/sigmoid: one exp + one log1p + one approx reciprocal
    # per element on the EUP (instead of two exps + log1p + divide).
    a = jnp.exp(-jnp.abs(m))
    sp = jnp.maximum(m, 0.0) + jnp.log1p(a)               # softplus(m)
    r = pl.reciprocal(1.0 + a, approx=True)
    sg = jnp.where(m >= 0.0, r, 1.0 - r)                  # sigmoid(m)

    # Sublane (P-axis) reductions -> [1, Q]; mostly VALU adds, plenty of slack vs. EUP.
    spsum_ref[...] += jnp.sum(sp, axis=0, keepdims=True)
    sgsum_ref[...] += jnp.sum(sg, axis=0, keepdims=True)

    # Two MXU passes contracting over P (dim 0 of BOTH operands -> no transposes of the
    # big tensors anywhere).  Results land in [T, Q] layout so the [1, Q] rowsums and the
    # [T, 1] target colsum broadcast directly.  bf16 operands, f32 accumulation.
    dn = (((0,), (0,)), ((), ()))
    t_bf = t.astype(jnp.bfloat16)
    md_ref[...] += lax.dot_general(t_bf, m.astype(jnp.bfloat16), dn,
                                   preferred_element_type=jnp.float32)
    sd_ref[...] += lax.dot_general(t_bf, sg.astype(jnp.bfloat16), dn,
                                   preferred_element_type=jnp.float32)

    @pl.when(k == pl.num_programs(1) - 1)
    def _finalize():
        # cost_mask = (rowsum(softplus(m)) - m @ T) / P   (softplus fold; /P folded in weight)
        cost_mask = spsum_ref[...] - md_ref[...]           # [1,Q] - [T,Q] -> [T,Q]
        denom = sgsum_ref[...] + tsum_ref[0] + 1.0         # [1,Q] + [T,1] -> [T,Q]
        cost_dice = 1.0 - (2.0 * sd_ref[...] + 1.0) / denom
        c_ref[0] = (2.0 * cc_ref[0]
                    + (5.0 / num_points) * cost_mask
                    + 2.0 * cost_dice).astype(c_ref.dtype)


def compute_cost_matrices(pred_logits, pred_masks, target_masks, *, tile_p=4096):
    """pred_logits [B,Q,C], pred_masks [B,P,Q], target_masks [B,P,T] -> costs [B,Q,T] f32."""
    B, Q, C = pred_logits.shape
    P = pred_masks.shape[1]
    T = target_masks.shape[2]
    assert pred_masks.shape == (B, P, Q), pred_masks.shape
    assert target_masks.shape == (B, P, T), target_masks.shape

    # Tiny exact-f32 precomputes (one cheap XLA op each). Everything heavy stays in the
    # kernel, and the big [B, P, Q] mask tensor gets NO extra HBM pass (no transpose /
    # cast / pad in the wrapper).
    cost_class = -jax.nn.softmax(pred_logits.astype(jnp.float32), axis=-1)[..., 0]
    cost_class = cost_class[:, None, :]                                    # [B, 1, Q]
    tgt_sum = jnp.sum(target_masks.astype(jnp.float32), axis=1)[:, :, None]  # [B, T, 1]
    masks = pred_masks.astype(jnp.float32)
    tgts = target_masks.astype(jnp.float32)

    # Reduction tile over points (multiple of 128).  4096 keeps the double-buffered blocks
    # well under every generation's default scoped-VMEM limit; if pushed to 8k-16k, set
    # pltpu.CompilerParams(vmem_limit_bytes=...) explicitly (v5e default is 16 MiB).
    tile_p = max(128, (int(tile_p) // 128) * 128)
    tile_p = min(tile_p, _round_up(P, 128))
    n_tiles = _round_up(P, tile_p) // tile_p
    mask_tail = (P % tile_p) != 0

    kernel = functools.partial(_cost_kernel, num_points=P, tile_p=tile_p,
                               mask_tail=mask_tail)

    # TODO(synk): on v7x with B == 1 only one of the two TensorCores gets work (batch is
    # the only parallel axis); a core-split of the P reduction with a cross-core combine
    # would fix that.
    c_tq = pl.pallas_call(
        kernel,
        out_shape=jax.ShapeDtypeStruct((B, T, Q), jnp.float32),
        grid_spec=pltpu.PrefetchScalarGridSpec(
            num_scalar_prefetch=0,
            grid=(B, n_tiles),
            in_specs=[
                pl.BlockSpec((1, 1, Q), lambda b, k: (b, 0, 0)),
                pl.BlockSpec((1, tile_p, Q), lambda b, k: (b, k, 0)),
                pl.BlockSpec((1, tile_p, T), lambda b, k: (b, k, 0)),
                pl.BlockSpec((1, T, 1), lambda b, k: (b, 0, 0)),
            ],
            out_specs=pl.BlockSpec((1, T, Q), lambda b, k: (b, 0, 0)),
            scratch_shapes=[
                pltpu.VMEM((T, Q), jnp.float32),   # T^t @ m accumulator
                pltpu.VMEM((T, Q), jnp.float32),   # T^t @ sigmoid(m) accumulator
                pltpu.VMEM((1, Q), jnp.float32),   # rowsum(softplus(m))
                pltpu.VMEM((1, Q), jnp.float32),   # rowsum(sigmoid(m))
            ],
        ),
        compiler_params=pltpu.CompilerParams(
            dimension_semantics=("parallel", "arbitrary")),
    )(cost_class, masks, tgts, tgt_sum)

    # Tiny [B, T, Q] -> [B, Q, T] to match the PyTorch cost-matrix orientation.
    return jnp.transpose(c_tq, (0, 2, 1))


def _linear_sum_assignment(cost):
    """Host-side assignment on a [Q, T] numpy cost matrix."""
    # TODO(synk): linear_sum_assignment (Hungarian algorithm) is combinatorial host-side
    # glue with no clean Pallas equivalent; scipy when available, greedy fallback otherwise
    # (the greedy fallback is NOT the exact Hungarian optimum).
    try:
        from scipy.optimize import linear_sum_assignment
        return linear_sum_assignment(cost)
    except Exception:
        Q, T = cost.shape
        n = min(Q, T)
        c = cost.astype(np.float64).copy()
        rows, cols = [], []
        for _ in range(n):
            r, t = np.unravel_index(np.argmin(c), c.shape)
            rows.append(int(r))
            cols.append(int(t))
            c[r, :] = np.inf
            c[:, t] = np.inf
        rows = np.asarray(rows)
        cols = np.asarray(cols)
        order = np.argsort(rows)
        return rows[order], cols[order]


class HungarianMatcher:
    """JAX/Pallas port: forward(outputs, targets, valid_bs) -> list of (index_i, index_j)."""

    def forward(self, outputs, targets, valid_bs=None):
        pred_logits = outputs["pred_logits"]   # [B, Q, C]
        pred_masks = outputs["pred_masks"]     # [B, P, Q]
        B = pred_logits.shape[0]
        if valid_bs is None:
            valid_bs = list(range(len(targets)))
        # TODO(synk): real Mask3D batches are ragged in num_targets; this port assumes a
        # uniform T per batch element (pad + mask target columns otherwise).
        tgt = jnp.stack([targets[i] for i in range(len(targets))], axis=0)   # [B, P, T]
        if list(valid_bs) == list(range(B)):
            logits_sel, masks_sel = pred_logits, pred_masks
        else:
            idx = jnp.asarray(list(valid_bs), dtype=jnp.int32)
            logits_sel = jnp.take(pred_logits, idx, axis=0)
            masks_sel = jnp.take(pred_masks, idx, axis=0)

        costs = compute_cost_matrices(logits_sel, masks_sel, tgt)
        costs = np.asarray(jax.block_until_ready(costs))

        indices = []
        for k in range(costs.shape[0]):
            i, j = _linear_sum_assignment(costs[k])
            indices.append((np.asarray(i, dtype=np.int64), np.asarray(j, dtype=np.int64)))
        return indices

    __call__ = forward


def _reference_costs(pred_logits, pred_masks, target_masks):
    """Pure-JAX f32 reference mirroring the PyTorch math."""
    prob = jax.nn.softmax(pred_logits.astype(jnp.float32), axis=-1)        # [B, Q, C]
    om = jnp.transpose(pred_masks, (0, 2, 1)).astype(jnp.float32)          # [B, Q, P]
    tm = jnp.transpose(target_masks, (0, 2, 1)).astype(jnp.float32)        # [B, T, P]
    P = om.shape[-1]
    pos = jax.nn.softplus(-om)
    neg = jax.nn.softplus(om)
    cost_mask = (jnp.einsum("bqp,btp->bqt", pos, tm)
                 + jnp.einsum("bqp,btp->bqt", neg, 1.0 - tm)) / P
    s = jax.nn.sigmoid(om)
    numer = 2.0 * jnp.einsum("bqp,btp->bqt", s, tm)
    denom = s.sum(-1)[:, :, None] + tm.sum(-1)[:, None, :]
    cost_dice = 1.0 - (numer + 1.0) / (denom + 1.0)
    cost_class = -jnp.broadcast_to(prob[:, :, 0:1], cost_mask.shape)
    return 2.0 * cost_class + 5.0 * cost_mask + 2.0 * cost_dice


if __name__ == "__main__":
    key = jax.random.PRNGKey(0)
    B, Q, C, T = 2, 16, 8, 8

    def run_case(P, tile_p):
        k1, k2, k3 = jax.random.split(jax.random.fold_in(key, P), 3)
        pred_logits = jax.random.normal(k1, (B, Q, C), dtype=jnp.float32)
        pred_masks = jax.random.normal(k2, (B, P, Q), dtype=jnp.float32)
        target_masks = (jax.random.uniform(k3, (B, P, T)) > 0.5).astype(jnp.float32)
        costs = jax.block_until_ready(
            compute_cost_matrices(pred_logits, pred_masks, target_masks, tile_p=tile_p))
        ref = jax.block_until_ready(
            _reference_costs(pred_logits, pred_masks, target_masks))
        # bf16 MXU operands + the approx reciprocal inside sigmoid vs. the f32 reference;
        # immaterial for the discrete assignment.
        np.testing.assert_allclose(np.asarray(costs), np.asarray(ref), rtol=2e-2, atol=2e-2)
        return pred_logits, pred_masks, target_masks

    # Multi-tile P reduction (384 = 3 x 128) and a partial-tail case (200 = 128 + 72).
    pred_logits, pred_masks, target_masks = run_case(P=384, tile_p=128)
    run_case(P=200, tile_p=128)

    outputs = {"pred_logits": pred_logits, "pred_masks": pred_masks}
    targets = [target_masks[b] for b in range(B)]
    matcher = HungarianMatcher()
    indices = matcher(outputs, targets)
    assert len(indices) == B
    for i, j in indices:
        assert len(i) == len(j) == min(Q, T)

    print("KERNEL_OK")
</pallas_src>

<mosaic_0001>
module attributes {stable_mosaic.version = 11 : i64} {
  func.func @_cost_kernel(%arg0: i32, %arg1: i32, %arg2: memref<1x1x16xf32, #tpu.memory_space<vmem>>, %arg3: memref<1x128x16xf32, #tpu.memory_space<vmem>>, %arg4: memref<1x128x8xf32, #tpu.memory_space<vmem>>, %arg5: memref<1x8x1xf32, #tpu.memory_space<vmem>>, %arg6: memref<1x8x16xf32, #tpu.memory_space<vmem>>, %arg7: memref<8x16xf32, #tpu.memory_space<vmem>>, %arg8: memref<8x16xf32, #tpu.memory_space<vmem>>, %arg9: memref<1x16xf32, #tpu.memory_space<vmem>>, %arg10: memref<1x16xf32, #tpu.memory_space<vmem>>) attributes {dimension_semantics = [#tpu.dimension_semantics<parallel>, #tpu.dimension_semantics<arbitrary>], iteration_bounds = array<i64: 2, 3>, scalar_prefetch = 0 : i64, scratch_operands = 4 : i64, tpu.core_type = #tpu.core_type<tc>, window_params = [{transform_indices = @transform_0, window_bounds = array<i64: 1, 1, 16>}, {transform_indices = @transform_1, window_bounds = array<i64: 1, 128, 16>}, {transform_indices = @transform_2, window_bounds = array<i64: 1, 128, 8>}, {transform_indices = @transform_3, window_bounds = array<i64: 1, 8, 1>}, {transform_indices = @transform_4, window_bounds = array<i64: 1, 8, 16>}]} {
    %c0_i32 = arith.constant 0 : i32
    %0 = arith.cmpi eq, %arg1, %c0_i32 : i32
    %1 = arith.extui %0 : i1 to i32
    %c0_i32_0 = arith.constant 0 : i32
    %2 = arith.cmpi ne, %1, %c0_i32_0 : i32
    scf.if %2 {
      %cst_31 = arith.constant 0.000000e+00 : f32
      %47 = vector.broadcast %cst_31 : f32 to vector<8x16xf32>
      %c0_32 = arith.constant 0 : index
      %c0_33 = arith.constant 0 : index
      %48 = vector.load %arg7[%c0_32, %c0_33] : memref<8x16xf32, #tpu.memory_space<vmem>>, vector<8x16xf32>
      tpu.vector_store %arg7[%c0_32, %c0_33], %47 {strides = array<i32>} : memref<8x16xf32, #tpu.memory_space<vmem>>, vector<8x16xf32>,
      %cst_34 = arith.constant 0.000000e+00 : f32
      %49 = vector.broadcast %cst_34 : f32 to vector<8x16xf32>
      %c0_35 = arith.constant 0 : index
      %c0_36 = arith.constant 0 : index
      %50 = vector.load %arg8[%c0_35, %c0_36] : memref<8x16xf32, #tpu.memory_space<vmem>>, vector<8x16xf32>
      tpu.vector_store %arg8[%c0_35, %c0_36], %49 {strides = array<i32>} : memref<8x16xf32, #tpu.memory_space<vmem>>, vector<8x16xf32>,
      %cst_37 = arith.constant 0.000000e+00 : f32
      %51 = vector.broadcast %cst_37 : f32 to vector<1x16xf32>
      %c0_38 = arith.constant 0 : index
      %c0_39 = arith.constant 0 : index
      %52 = vector.load %arg9[%c0_38, %c0_39] : memref<1x16xf32, #tpu.memory_space<vmem>>, vector<1x16xf32>
      tpu.vector_store %arg9[%c0_38, %c0_39], %51 {strides = array<i32>} : memref<1x16xf32, #tpu.memory_space<vmem>>, vector<1x16xf32>,
      %cst_40 = arith.constant 0.000000e+00 : f32
      %53 = vector.broadcast %cst_40 : f32 to vector<1x16xf32>
      %c0_41 = arith.constant 0 : index
      %c0_42 = arith.constant 0 : index
      %54 = vector.load %arg10[%c0_41, %c0_42] : memref<1x16xf32, #tpu.memory_space<vmem>>, vector<1x16xf32>
      tpu.vector_store %arg10[%c0_41, %c0_42], %53 {strides = array<i32>} : memref<1x16xf32, #tpu.memory_space<vmem>>, vector<1x16xf32>,
    } else {
    }
    %c0 = arith.constant 0 : index
    %c0_1 = arith.constant 0 : index
    %c0_2 = arith.constant 0 : index
    %3 = vector.load %arg3[%c0, %c0_1, %c0_2] : memref<1x128x16xf32, #tpu.memory_space<vmem>>, vector<1x128x16xf32>
    %4 = vector.shape_cast %3 : vector<1x128x16xf32> to vector<128x16xf32>
    %c0_3 = arith.constant 0 : index
    %c0_4 = arith.constant 0 : index
    %c0_5 = arith.constant 0 : index
    %5 = vector.load %arg4[%c0_3, %c0_4, %c0_5] : memref<1x128x8xf32, #tpu.memory_space<vmem>>, vector<1x128x8xf32>
    %6 = vector.shape_cast %5 : vector<1x128x8xf32> to vector<128x8xf32>
    %7 = math.absf %4 : vector<128x16xf32>
    %cst = arith.constant 0.000000e+00 : f32
    %8 = vector.broadcast %cst : f32 to vector<128x16xf32>
    %9 = arith.subf %8, %7 : vector<128x16xf32>
    %10 = math.exp %9 : vector<128x16xf32>
    %cst_6 = arith.constant 0.000000e+00 : f32
    %11 = vector.broadcast %cst_6 : f32 to vector<128x16xf32>
    %12 = arith.maximumf %4, %11 : vector<128x16xf32>
    %13 = math.log1p %10 : vector<128x16xf32>
    %14 = arith.addf %12, %13 : vector<128x16xf32>
    %cst_7 = arith.constant 1.000000e+00 : f32
    %15 = vector.broadcast %cst_7 : f32 to vector<128x16xf32>
    %16 = arith.addf %15, %10 : vector<128x16xf32>
    %17 = tpu.reciprocal %16 {approx = true} : vector<128x16xf32> -> vector<128x16xf32>
    %cst_8 = arith.constant 0.000000e+00 : f32
    %18 = vector.broadcast %cst_8 : f32 to vector<128x16xf32>
    %19 = arith.cmpf oge, %4, %18 : vector<128x16xf32>
    %cst_9 = arith.constant 1.000000e+00 : f32
    %20 = vector.broadcast %cst_9 : f32 to vector<128x16xf32>
    %21 = arith.subf %20, %17 : vector<128x16xf32>
    %22 = arith.select %19, %17, %21 : vector<128x16xi1>, vector<128x16xf32>
    %c0_10 = arith.constant 0 : index
    %c0_11 = arith.constant 0 : index
    %23 = vector.load %arg9[%c0_10, %c0_11] : memref<1x16xf32, #tpu.memory_space<vmem>>, vector<1x16xf32>
    %cst_12 = arith.constant dense<0.000000e+00> : vector<16xf32>
    %24 = vector.multi_reduction <add>, %14, %cst_12 [0] : vector<128x16xf32> to vector<16xf32>
    %25 = vector.shape_cast %24 : vector<16xf32> to vector<1x16xf32>
    %26 = arith.addf %23, %25 : vector<1x16xf32>
    %c0_13 = arith.constant 0 : index
    %c0_14 = arith.constant 0 : index
    %27 = vector.load %arg9[%c0_13, %c0_14] : memref<1x16xf32, #tpu.memory_space<vmem>>, vector<1x16xf32>
    tpu.vector_store %arg9[%c0_13, %c0_14], %26 {strides = array<i32>} : memref<1x16xf32, #tpu.memory_space<vmem>>, vector<1x16xf32>,
    %c0_15 = arith.constant 0 : index
    %c0_16 = arith.constant 0 : index
    %28 = vector.load %arg10[%c0_15, %c0_16] : memref<1x16xf32, #tpu.memory_space<vmem>>, vector<1x16xf32>
    %cst_17 = arith.constant dense<0.000000e+00> : vector<16xf32>
    %29 = vector.multi_reduction <add>, %22, %cst_17 [0] : vector<128x16xf32> to vector<16xf32>
    %30 = vector.shape_cast %29 : vector<16xf32> to vector<1x16xf32>
    %31 = arith.addf %28, %30 : vector<1x16xf32>
    %c0_18 = arith.constant 0 : index
    %c0_19 = arith.constant 0 : index
    %32 = vector.load %arg10[%c0_18, %c0_19] : memref<1x16xf32, #tpu.memory_space<vmem>>, vector<1x16xf32>
    tpu.vector_store %arg10[%c0_18, %c0_19], %31 {strides = array<i32>} : memref<1x16xf32, #tpu.memory_space<vmem>>, vector<1x16xf32>,
    %33 = arith.truncf %6 : vector<128x8xf32> to vector<128x8xbf16>
    %c0_20 = arith.constant 0 : index
    %c0_21 = arith.constant 0 : index
    %34 = vector.load %arg7[%c0_20, %c0_21] : memref<8x16xf32, #tpu.memory_space<vmem>>, vector<8x16xf32>
    %35 = arith.truncf %4 : vector<128x16xf32> to vector<128x16xbf16>
    %cst_22 = arith.constant dense<0.000000e+00> : vector<8x16xf32>
    %36 = tpu.matmul %33, %35, %cst_22 {dimension_numbers = #tpu.dot_dimension_numbers<[0], [0], [1], [1], [0, 1, 1, 1], [], []>} : vector<128x8xbf16>, vector<128x16xbf16>, vector<8x16xf32> -> vector<8x16xf32>
    %37 = arith.addf %34, %36 : vector<8x16xf32>
    %c0_23 = arith.constant 0 : index
    %c0_24 = arith.constant 0 : index
    %38 = vector.load %arg7[%c0_23, %c0_24] : memref<8x16xf32, #tpu.memory_space<vmem>>, vector<8x16xf32>
    tpu.vector_store %arg7[%c0_23, %c0_24], %37 {strides = array<i32>} : memref<8x16xf32, #tpu.memory_space<vmem>>, vector<8x16xf32>,
    %c0_25 = arith.constant 0 : index
    %c0_26 = arith.constant 0 : index
    %39 = vector.load %arg8[%c0_25, %c0_26] : memref<8x16xf32, #tpu.memory_space<vmem>>, vector<8x16xf32>
    %40 = arith.truncf %22 : vector<128x16xf32> to vector<128x16xbf16>
    %cst_27 = arith.constant dense<0.000000e+00> : vector<8x16xf32>
    %41 = tpu.matmul %33, %40, %cst_27 {dimension_numbers = #tpu.dot_dimension_numbers<[0], [0], [1], [1], [0, 1, 1, 1], [], []>} : vector<128x8xbf16>, vector<128x16xbf16>, vector<8x16xf32> -> vector<8x16xf32>
    %42 = arith.addf %39, %41 : vector<8x16xf32>
    %c0_28 = arith.constant 0 : index
    %c0_29 = arith.constant 0 : index
    %43 = vector.load %arg8[%c0_28, %c0_29] : memref<8x16xf32, #tpu.memory_space<vmem>>, vector<8x16xf32>
    tpu.vector_store %arg8[%c0_28, %c0_29], %42 {strides = array<i32>} : memref<8x16xf32, #tpu.memory_space<vmem>>, vector<8x16xf32>,
    %c2_i32 = arith.constant 2 : i32
    %44 = arith.cmpi eq, %arg1, %c2_i32 : i32
    %45 = arith.extui %44 : i1 to i32
    %c0_i32_30 = arith.constant 0 : i32
    %46 = arith.cmpi ne, %45, %c0_i32_30 : i32
    scf.if %46 {
      %c0_31 = arith.constant 0 : index
      %c0_32 = arith.constant 0 : index
      %47 = vector.load %arg9[%c0_31, %c0_32] : memref<1x16xf32, #tpu.memory_space<vmem>>, vector<1x16xf32>
      %c0_33 = arith.constant 0 : index
      %c0_34 = arith.constant 0 : index
      %48 = vector.load %arg7[%c0_33, %c0_34] : memref<8x16xf32, #tpu.memory_space<vmem>>, vector<8x16xf32>
      %49 = vector.broadcast %47 : vector<1x16xf32> to vector<8x16xf32>
      %50 = arith.subf %49, %48 : vector<8x16xf32>
      %c0_35 = arith.constant 0 : index
      %c0_36 = arith.constant 0 : index
      %51 = vector.load %arg10[%c0_35, %c0_36] : memref<1x16xf32, #tpu.memory_space<vmem>>, vector<1x16xf32>
      %c0_37 = arith.constant 0 : index
      %c0_38 = arith.constant 0 : index
      %c0_39 = arith.constant 0 : index
      %52 = vector.load %arg5[%c0_37, %c0_38, %c0_39] : memref<1x8x1xf32, #tpu.memory_space<vmem>>, vector<1x8x1xf32>
      %53 = vector.shape_cast %52 : vector<1x8x1xf32> to vector<8x1xf32>
      %54 = vector.broadcast %51 : vector<1x16xf32> to vector<8x16xf32>
      %55 = vector.broadcast %53 : vector<8x1xf32> to vector<8x16xf32>
      %56 = arith.addf %54, %55 : vector<8x16xf32>
      %cst_40 = arith.constant 1.000000e+00 : f32
      %57 = vector.broadcast %cst_40 : f32 to vector<8x16xf32>
      %58 = arith.addf %56, %57 : vector<8x16xf32>
      %c0_41 = arith.constant 0 : index
      %c0_42 = arith.constant 0 : index
      %59 = vector.load %arg8[%c0_41, %c0_42] : memref<8x16xf32, #tpu.memory_space<vmem>>, vector<8x16xf32>
      %cst_43 = arith.constant 2.000000e+00 : f32
      %60 = vector.broadcast %cst_43 : f32 to vector<8x16xf32>
      %61 = arith.mulf %60, %59 : vector<8x16xf32>
      %cst_44 = arith.constant 1.000000e+00 : f32
      %62 = vector.broadcast %cst_44 : f32 to vector<8x16xf32>
      %63 = arith.addf %61, %62 : vector<8x16xf32>
      %64 = arith.divf %63, %58 : vector<8x16xf32>
      %cst_45 = arith.constant 1.000000e+00 : f32
      %65 = vector.broadcast %cst_45 : f32 to vector<8x16xf32>
      %66 = arith.subf %65, %64 : vector<8x16xf32>
      %c0_46 = arith.constant 0 : index
      %c0_47 = arith.constant 0 : index
      %c0_48 = arith.constant 0 : index
      %67 = vector.load %arg2[%c0_46, %c0_47, %c0_48] : memref<1x1x16xf32, #tpu.memory_space<vmem>>, vector<1x1x16xf32>
      %68 = vector.shape_cast %67 : vector<1x1x16xf32> to vector<1x16xf32>
      %cst_49 = arith.constant 2.000000e+00 : f32
      %69 = vector.broadcast %cst_49 : f32 to vector<1x16xf32>
      %70 = arith.mulf %69, %68 : vector<1x16xf32>
      %cst_50 = arith.constant 0.013020833 : f32
      %71 = vector.broadcast %cst_50 : f32 to vector<8x16xf32>
      %72 = arith.mulf %71, %50 : vector<8x16xf32>
      %73 = vector.broadcast %70 : vector<1x16xf32> to vector<8x16xf32>
      %74 = arith.addf %73, %72 : vector<8x16xf32>
      %cst_51 = arith.constant 2.000000e+00 : f32
      %75 = vector.broadcast %cst_51 : f32 to vector<8x16xf32>
      %76 = arith.mulf %75, %66 : vector<8x16xf32>
      %77 = arith.addf %74, %76 : vector<8x16xf32>
      %c0_52 = arith.constant 0 : index
      %c0_53 = arith.constant 0 : index
      %c0_54 = arith.constant 0 : index
      %78 = vector.load %arg6[%c0_52, %c0_53, %c0_54] : memref<1x8x16xf32, #tpu.memory_space<vmem>>, vector<1x8x16xf32>
      %79 = vector.shape_cast %78 : vector<1x8x16xf32> to vector<8x16xf32>
      %80 = vector.shape_cast %77 : vector<8x16xf32> to vector<1x8x16xf32>
      tpu.vector_store %arg6[%c0_52, %c0_53, %c0_54], %80 {strides = array<i32>} : memref<1x8x16xf32, #tpu.memory_space<vmem>>, vector<1x8x16xf32>,
    } else {
    }
    return
  }
  func.func @transform_0(%arg0: i32, %arg1: i32) -> (i32, i32, i32) {
    %c0_i32 = arith.constant 0 : i32
    %c0_i32_0 = arith.constant 0 : i32
    %c0_i32_1 = arith.constant 0 : i32
    return %arg0, %c0_i32, %c0_i32_0 : i32, i32, i32
  }
  func.func @transform_1(%arg0: i32, %arg1: i32) -> (i32, i32, i32) {
    %c0_i32 = arith.constant 0 : i32
    %c0_i32_0 = arith.constant 0 : i32
    return %arg0, %arg1, %c0_i32 : i32, i32, i32
  }
  func.func @transform_2(%arg0: i32, %arg1: i32) -> (i32, i32, i32) {
    %c0_i32 = arith.constant 0 : i32
    %c0_i32_0 = arith.constant 0 : i32
    return %arg0, %arg1, %c0_i32 : i32, i32, i32
  }
  func.func @transform_3(%arg0: i32, %arg1: i32) -> (i32, i32, i32) {
    %c0_i32 = arith.constant 0 : i32
    %c0_i32_0 = arith.constant 0 : i32
    %c0_i32_1 = arith.constant 0 : i32
    return %arg0, %c0_i32, %c0_i32_0 : i32, i32, i32
  }
  func.func @transform_4(%arg0: i32, %arg1: i32) -> (i32, i32, i32) {
    %c0_i32 = arith.constant 0 : i32
    %c0_i32_0 = arith.constant 0 : i32
    %c0_i32_1 = arith.constant 0 : i32
    return %arg0, %c0_i32, %c0_i32_0 : i32, i32, i32
  }
}

</mosaic_0001>

<bundles_post_ra>
// kernel: tpu_custom_call.1
= control target key start
LH: loop header
LB: loop body
LE: loop exit
PB: predicated region body
PF: predicated region fallthrough
CT: control target
= control target key end

     0   :  { %9 = vsyncpa [#allocation7], 0  ;;  %s1972_s0 = inlined_call_operand.vmem [shape: f32[2,1,16], index: 0, kind: input, shape index: {}]   ;;  %s1973_s1 = inlined_call_operand.vmem [shape: f32[2,384,16], index: 1, kind: input, shape index: {}]   ;;  %s1974_s2 = inlined_call_operand.vmem [shape: f32[2,384,8], index: 2, kind: input, shape index: {}]   ;;  %s1975_s3 = inlined_call_operand.vmem [shape: f32[2,8,1], index: 3, kind: input, shape index: {}]   ;;  %s1976_s4 = inlined_call_operand.hbm [shape: f32[2,8,16], index: 4, kind: output, shape index: {}]  }
   0x1   :  { %11 = vsyncpa [#allocation7 + $0x1], 0  ;;  %s1416_s15 = smov 0   ;;  %s1418_s16 = smov 0  }
   0x2   :  { %s1420_s17 = smov 0   ;;  %s1422_s18 = smov 0  }
   0x3   :  { %s1424_s19 = smov 0   ;;  %s1426_s20 = smov 0  }
   0x4   :  { %s1428_s21 = smov 0   ;;  %s1430_s22 = smov 0  }
   0x5 LB: > { %1982 = sst [smem:[#allocation9_spill]] %s1364_s17  ;;  %s1038_s23 = sadd.s32 4294967295, %s1384_s22   ;;  %s1384_s22 = sphi %s1430_s22, %s17_s22   ;;  %s1380_s21 = sphi %s1428_s21, %s2026_s21   ;;  %s1376_s20 = sphi %s1426_s20, %s2030_s20   ;;  %s1372_s19 = sphi %s1424_s19, %s2024_s19   ;;  %s1368_s18 = sphi %s1422_s18, %s2023_s18   ;;  %s1364_s17 = sphi %s1420_s17, %s2029_s17   ;;  %s1360_s16 = sphi %s1418_s16, %s2028_s16   ;;  %s1356_s15 = sphi %s1416_s15, %s2027_s15  }
   0x6   : > { %1983 = sst [smem:[#allocation10_spill]] %s1376_s20  ;;  %s1039_s24 = sadd.s32 4294967294, %s1384_s22  }
   0x7   : > { %1984 = sst [smem:[#allocation11_spill]] %s1380_s21  ;;  %s26_s25 = sadd.s32 1, %s1376_s20 }
   0x8   : > { %p27_p0 = scmp.ge.s32.totalorder %s26_s25, 3  ;;  %s29_s26 = sadd.s32 1, %s1380_s21 }
   0x9   : > { %p154_p1 = scmp.ne.s32.totalorder %s1364_s17, %s1360_s16  ;;  %p155_p2 = scmp.eq.s32.totalorder %s1038_s23, 5 }
   0xa   : > { %s2032_s25 = smov (%p27_p0, %s26_s25), 0  ;;  %s2034_s26 = smov (!%p27_p0, %s29_s26), %s1380_s21 }
   0xb   : > { %1985 = sst [smem:[#allocation12_spill]] %s2032_s25  ;;  %p1465_p3 = por %p155_p2, %p154_p1 }
   0xc   : > { %p160_p4 = scmp.ne.s32.totalorder %s1360_s16, %s1356_s15  ;;  %p31_p5 = scmp.ge.s32.totalorder %s2034_s26, 2 }
   0xd   : > { %p161_p6 = scmp.eq.s32.totalorder %s1039_s24, 5  ;;  %p1042_p7 = scmp.ge.s32.totalorder %s1384_s22, 1 }
   0xe   : > { %p218_p8 = scmp.lt.s32.totalorder %s1384_s22, 7  ;;  %s2036_s26 = smov (%p31_p5, %s2034_s26), 0 }
   0xf   : > { %1987 = sst [smem:[#allocation13_spill]] %s2036_s26  ;;  %p1475_p9 = por %p161_p6, %p160_p4 }
  0x10   : > { %p219_p10 = pnand %p1042_p7, %p218_p8  ;;  %s141_s29 = ssub.s32 %s1380_s21, %s2036_s26 }
  0x11   : > { %s144_s30 = sadd.s32 1, %s1364_s17  ;;  %p142_p11 = scmp.eq.s32.totalorder %s141_s29, 0 }
  0x12   : > { %222 = sbr.rel (%p219_p10) target bundleno = 406 (0x196), region = 36  ;;  %s1977_s6 = sand.u32 (!%p219_p10), 1, %s1360_s16  }
  0x13   : > { %s1483_s5 = scalar_select %p142_p11, %s1364_s17, %s144_s30  }
  0x14   : > { %p264_p12 = scmp.lt.s32.totalorder (!%p219_p10), %s1372_s19, 1  ;;  %s1489_s7 = sshll.u32 (!%p219_p10), %s1977_s6, 3 }
  0x15   : > { %1989 = sst [smem:[#allocation14_spill]] %s1483_s5  ;;  %s1044_s8 = sshll.u32 (!%p219_p10), %s1368_s18, 4 }
  0x16   : > { %p270_p13 = scmp.lt.s32.totalorder (!%p219_p10), %s1044_s8, 47  ;;  %s263_s10 = scalar_lea.vmem (!%p219_p10), [#allocation6], %s1489_s7 }
  0x17   : > { %p1049_p0 = scmp.ne.s32.totalorder (!%p219_p10), %s1368_s18, 0 }
  0x19   : > { %s1493_s9 = scalar_select %p264_p12, %s1372_s19, 1 }
  0x1a   : > { %s2038_s8 = smov (!%p270_p13, %s1044_s8), 47  ;;  %295 = sbr.rel (%p1049_p0) target bundleno = 33 (0x21), region = 40 }
  0x1b   : > { %s266_s12 = scalar_lea.vmem %s1972_s0, %s1493_s9  ;;  %s1115_s13 = smul.u32 48, %s1493_s9  ;;  %vm296_vm0 = vcmask (!%p1049_p0), 130048   ;;  %vm299_vm1 = vcmask (!%p1049_p0), 122880   ;;  %v1386_v0 = vmov (!%p1049_p0), 0.0  }
  0x1c   : > { %s1048_s14 = sshll.u32 %s1493_s9, 3  ;;  %297 = vst.msk [vmem:[#allocation2] sm:$0xff] (!%p1049_p0), %vm296_vm0, %v1386_v0  ;;  %298 = vst.msk [vmem:[#allocation3] sm:$0xff] (!%p1049_p0), %vm296_vm0, %v1386_v0 }
  0x1d   : > { %s273_s23 = sadd.s32 %s1115_s13, %s2038_s8  ;;  %s1504_s30 = scalar_lea.vmem %s1975_s3, %s1048_s14  ;;  %300 = vst.msk [vmem:[#allocation4] sm:$0x1] (!%p1049_p0), %vm299_vm1, %v1386_v0  ;;  %301 = vst.msk [vmem:[#allocation5] sm:$0x1] (!%p1049_p0), %vm299_vm1, %v1386_v0 }
  0x1e   : > { %s1045_s6 = sshll.u32 %s273_s23, 3 }
  0x1f   : > { %s1509_s21 = scalar_lea.vmem %s1973_s1, %s1045_s6  ;;  %s1514_s17 = scalar_lea.vmem %s1974_s2, %s1045_s6 }
  0x21 PF: > { %v318_v1 = vld [vmem:[%s1514_s17] sm:$0xff]  ;;  %v319_v2 = vld [vmem:[%s1514_s17 + $0x8] sm:$0xff]  ;;  %v320_v3 = vld [vmem:[%s1514_s17 + $0x10] sm:$0xff]  ;;  %v1387_v6 = vmov 0.0   ;;  %vm1388_vm2 = vmmov 0   ;;  %vm655_vm6 = vcmask 130048  }
  0x22   : > { %v736_v4 = vpack.c.bf16 %v319_v2, %v318_v1  ;;  %v321_v5 = vld [vmem:[%s1514_s17 + $0x18] sm:$0xff]  ;;  %1075 = vmatprep.subr.bf16.mxu0 %v1387_v6  ;;  %1095 = vmatprep.subr.bf16.mxu1 %v1387_v6  ;;  %v322_v8 = vld [vmem:[%s1514_s17 + $0x20] sm:$0xff]  ;;  %v323_v9 = vld [vmem:[%s1514_s17 + $0x28] sm:$0xff]  ;;  %p1050_p1 = scmp.ne.s32.totalorder %s1368_s18, 2 }
  0x23   : > { %1091 = vmatprep.mubr.msk.bf16.mxu0 %vm1388_vm2, %v1387_v6  ;;  %1111 = vmatprep.mubr.msk.bf16.mxu1 %vm1388_vm2, %v1387_v6  ;;  %v737_v7 = vpack.c.bf16 %v321_v5, %v320_v3  ;;  %v1529_v10 = vld [vmem:[%s1509_s21] sm:$0xff]  ;;  %v1532_v11 = vld [vmem:[%s1509_s21 + $0x8] sm:$0xff]  ;;  %v324_v12 = vld [vmem:[%s1514_s17 + $0x30] sm:$0xff]  ;;  %v738_v16 = vpack.c.bf16 %v323_v9, %v322_v8 }
  0x24   : > { %753 = vxpose.xlu0.c.b16.start [1/8] (narrow) %v736_v4, 16  ;;  %v334_v13 = vand.u32 2147483647, %v1529_v10  ;;  %v335_v14 = vand.u32 2147483647, %v1532_v11  ;;  %v1538_v15 = vld [vmem:[%s1509_s21 + $0x10] sm:$0xff]  ;;  %v745_v18 = vpack.c.bf16 %v1532_v11, %v1529_v10 }
  0x25   : > { %v325_v17 = vld [vmem:[%s1514_s17 + $0x38] sm:$0xff]  ;;  %v1547_v20 = vld [vmem:[%s1509_s21 + $0x20] sm:$0xff]  ;;  %v336_v23 = vand.u32 2147483647, %v1538_v15  ;;  %v1554_v26 = vld [vmem:[%s1509_s21 + $0x28] sm:$0xff]  ;;  %vm606_vm5 = vcmp.ge.f32.partialorder %v1529_v10, 0.0 }
  0x26   : > { %v1544_v19 = vld [vmem:[%s1509_s21 + $0x18] sm:$0xff]  ;;  %v350_v21 = vsub.f32 0.0, %v334_v13  ;;  %v351_v22 = vsub.f32 0.0, %v335_v14  ;;  %1076 = vmatpush3.bf16.msra.mxu0 %v745_v18  ;;  %v739_v31 = vpack.c.bf16 %v325_v17, %v324_v12  ;;  %v338_v32 = vand.u32 2147483647, %v1547_v20  ;;  %v1560_v34 = vld [vmem:[%s1509_s21 + $0x30] sm:$0xff] }
  0x27   : > { %v337_v24 = vand.u32 2147483647, %v1544_v19  ;;  %v746_v25 = vpack.c.bf16 %v1544_v19, %v1538_v15  ;;  %1077 = vmatprep.subr.bf16.mxu0 %v1387_v6  ;;  %v352_v29 = vsub.f32 0.0, %v336_v23  ;;  %v339_v33 = vand.u32 2147483647, %v1554_v26  ;;  %v326_v35 = vld [vmem:[%s1514_s17 + $0x40] sm:$0xff] }
  0x28   : > { %754 = vxpose.xlu0.c.b16.cont [2/8] (narrow) %v737_v7, 16  ;;  %v366_v27 = vmul.f32 1.442695, %v350_v21  ;;  %v368_v28 = vmul.f32 1.442695, %v351_v22  ;;  %v327_v36 = vld [vmem:[%s1514_s17 + $0x48] sm:$0xff]  ;;  %v747_v41 = vpack.c.bf16 %v1554_v26, %v1547_v20 }
  0x29   : > { %v353_v30 = vsub.f32 0.0, %v337_v24  ;;  %v370_v37 = vmul.f32 1.442695, %v352_v29  ;;  %v354_v39 = vsub.f32 0.0, %v338_v32  ;;  %v355_v40 = vsub.f32 0.0, %v339_v33  ;;  %v1567_v42 = vld [vmem:[%s1509_s21 + $0x38] sm:$0xff] }
  0x2a   : > { %1191 = vpow2.f32 %v366_v27  ;;  %1078 = vmatpush3.bf16.msra.mxu0 %v746_v25  ;;  %v340_v43 = vand.u32 2147483647, %v1560_v34  ;;  %v1572_v44 = vld [vmem:[%s1509_s21 + $0x40] sm:$0xff]  ;;  %v740_v45 = vpack.c.bf16 %v327_v36, %v326_v35  ;;  %v1575_v48 = vld [vmem:[%s1509_s21 + $0x48] sm:$0xff]  ;;  %v328_v49 = vld [vmem:[%s1514_s17 + $0x50] sm:$0xff]  ;;  %v748_v53 = vpack.c.bf16 %v1567_v42, %v1560_v34 }
  0x2b   : > { %v372_v38 = vmul.f32 1.442695, %v353_v30  ;;  %1193 = vpow2.f32 %v368_v28  ;;  %1079 = vmatprep.subr.bf16.mxu0 %v1387_v6  ;;  %v374_v46 = vmul.f32 1.442695, %v354_v39  ;;  %v376_v47 = vmul.f32 1.442695, %v355_v40 }
  0x2c   : > { %755 = vxpose.xlu0.c.b16.cont [3/8] (narrow) %v738_v16, 16  ;;  %1195 = vpow2.f32 %v370_v37  ;;  %v329_v50 = vld [vmem:[%s1514_s17 + $0x58] sm:$0xff]  ;;  %v341_v51 = vand.u32 2147483647, %v1567_v42  ;;  %v356_v52 = vsub.f32 0.0, %v340_v43  ;;  %v330_v55 = vld [vmem:[%s1514_s17 + $0x60] sm:$0xff]  ;;  %v749_v3 = vpack.c.bf16 %v1575_v48, %v1572_v44 }
  0x2d   : > { %1197 = vpow2.f32 %v372_v38  ;;  %v342_v54 = vand.u32 2147483647, %v1572_v44  ;;  %v343_v58 = vand.u32 2147483647, %v1575_v48  ;;  %v741_v59 = vpack.c.bf16 %v329_v50, %v328_v49  ;;  %v331_v60 = vld [vmem:[%s1514_s17 + $0x68] sm:$0xff]  ;;  %v332_v61 = vld [vmem:[%s1514_s17 + $0x70] sm:$0xff] }
  0x2e   : > { %1080 = vmatpush3.bf16.msra.mxu0 %v747_v41  ;;  %1199 = vpow2.f32 %v374_v46  ;;  %v357_v56 = vsub.f32 0.0, %v341_v51  ;;  %v378_v57 = vmul.f32 1.442695, %v356_v52  ;;  %v333_v62 = vld [vmem:[%s1514_s17 + $0x78] sm:$0xff]  ;;  %v742_v5 = vpack.c.bf16 %v331_v60, %v330_v55 }
  0x2f   : > { %1081 = vmatprep.subr.bf16.mxu0 %v1387_v6  ;;  %1201 = vpow2.f32 %v376_v47  ;;  %v358_v63 = vsub.f32 0.0, %v342_v54  ;;  %v359_v1 = vsub.f32 0.0, %v343_v58  ;;  %v743_v7 = vpack.c.bf16 %v333_v62, %v332_v61 }
  0x30   : > { %756 = vxpose.xlu0.c.b16.cont [4/8] (narrow) %v739_v31, 16  ;;  %v380_v0 = vmul.f32 1.442695, %v357_v56  ;;  %1203 = vpow2.f32 %v378_v57  ;;  %v398_v12 = vmax.f32 %v1529_v10, 0.0  ;;  %v399_v13 = vmax.f32 %v1532_v11, 0.0 }
  0x31   : > { %v382_v2 = vmul.f32 1.442695, %v358_v63  ;;  %v384_v8 = vmul.f32 1.442695, %v359_v1  ;;  %v400_v21 = vmax.f32 %v1538_v15, 0.0  ;;  %v401_v27 = vmax.f32 %v1544_v19, 0.0 }
  0x32   : > { %1082 = vmatpush3.bf16.msra.mxu0 %v748_v53  ;;  %1205 = vpow2.f32 %v380_v0  ;;  %v402_v29 = vmax.f32 %v1547_v20, 0.0  ;;  %v403_v31 = vmax.f32 %v1554_v26, 0.0  ;;  %v404_v32 = vmax.f32 %v1560_v34, 0.0 }
  0x33   : > { %1083 = vmatprep.subr.bf16.mxu0 %v1387_v6  ;;  %1207 = vpow2.f32 %v382_v2  ;;  %vm607_vm7 = vcmp.ge.f32.partialorder %v1532_v11, 0.0  ;;  %vm608_vm10 = vcmp.ge.f32.partialorder %v1538_v15, 0.0  ;;  %vm609_vm11 = vcmp.ge.f32.partialorder %v1544_v19, 0.0 }
  0x34   : > { %757 = vxpose.xlu0.c.b16.cont [5/8] (narrow) %v740_v45, 16  ;;  %v1192_v4 = vpop.eup %1191  ;;  %1209 = vpow2.f32 %v384_v8  ;;  %vm610_vm14 = vcmp.ge.f32.partialorder %v1547_v20, 0.0  ;;  %vm611_vm15 = vcmp.ge.f32.partialorder %v1554_v26, 0.0  ;;  %vm612_vm2 = vcmp.ge.f32.partialorder %v1560_v34, 0.0 }
  0x35   : > { %v1194_v9 = vpop.eup %1193  ;;  %v414_v14 = vadd.f32 1.0, %v1192_v4  ;;  %v417_v17 = vmul.f32 -0.5, %v1192_v4  ;;  %v420_v23 = vand.u32 2147483647, %v1192_v4 }
  0x36   : > { %v1196_v16 = vpop.eup %1195  ;;  %v423_v18 = vadd.f32 1.0, %v1194_v9  ;;  %v426_v24 = vmul.f32 -0.5, %v1194_v9  ;;  %v429_v25 = vand.u32 2147483647, %v1194_v9  ;;  %1084 = vmatpush3.bf16.msra.mxu0 %v749_v3 }
  0x37   : > { %v1198_v22 = vpop.eup %1197  ;;  %1211 = vlog2.f32 %v414_v14  ;;  %v435_v28 = vmul.f32 -0.5, %v1196_v16  ;;  %1085 = vmatprep.subr.bf16.mxu0 %v1387_v6  ;;  %v432_v30 = vadd.f32 1.0, %v1196_v16  ;;  %v418_v35 = vadd.f32 1.0, %v417_v17 }
  0x38   : > { %758 = vxpose.xlu0.c.b16.cont [6/8] (narrow) %v741_v59, 16  ;;  %1213 = vlog2.f32 %v423_v18  ;;  %v1200_v33 = vpop.eup %1199  ;;  %v441_v36 = vadd.f32 1.0, %v1198_v22  ;;  %v444_v37 = vmul.f32 -0.5, %v1198_v22  ;;  %vm1602_vm3 = vcmp.lt.f32.partialorder %v420_v23, 0.0004427343 }
  0x39   : > { %1215 = vrcp.f32 %v414_v14  ;;  %v1600_v38 = vpop.eup %1201  ;;  %v427_v40 = vadd.f32 1.0, %v426_v24  ;;  %vm1606_vm4 = vcmp.lt.f32.partialorder %v429_v25, 0.0004427343  ;;  %v436_v43 = vadd.f32 1.0, %v435_v28 }
  0x3a   : > { %1217 = vrcp.f32 %v423_v18  ;;  %v438_v45 = vand.u32 2147483647, %v1196_v16  ;;  %v453_v46 = vmul.f32 -0.5, %v1200_v33  ;;  %v1612_v47 = vpop.eup %1203  ;;  %v445_v49 = vadd.f32 1.0, %v444_v37 }
  0x3b   : > { %1219 = vlog2.f32 %v432_v30  ;;  %v447_v50 = vand.u32 2147483647, %v1198_v22  ;;  %v450_v51 = vadd.f32 1.0, %v1200_v33  ;;  %v456_v54 = vand.u32 2147483647, %v1200_v33 }
  0x3c   : > { %759 = vxpose.xlu0.c.b16.cont [7/8] (narrow) %v742_v5, 16  ;;  %1221 = vlog2.f32 %v441_v36  ;;  %v1614_v52 = vpop.eup %1205  ;;  %v454_v53 = vadd.f32 1.0, %v453_v46  ;;  %v459_v55 = vadd.f32 1.0, %v1600_v38  ;;  %v419_v57 = vmul.f32 %v1192_v4, %v418_v35 }
  0x3d   : > { %1223 = vrcp.f32 %v432_v30  ;;  %v1617_v56 = vpop.eup %1207  ;;  %v428_v58 = vmul.f32 %v1194_v9, %v427_v40  ;;  %v462_v59 = vmul.f32 -0.5, %v1600_v38  ;;  %v437_v61 = vmul.f32 %v1196_v16, %v436_v43 }
  0x3e   : > { %1225 = vrcp.f32 %v441_v36  ;;  %v1620_v60 = vpop.eup %1209  ;;  %vm1622_vm8 = vcmp.lt.f32.partialorder %v438_v45, 0.0004427343  ;;  %v465_v63 = vand.u32 2147483647, %v1600_v38  ;;  %v446_v1 = vmul.f32 %v1198_v22, %v445_v49 }
  0x3f   : > { %1227 = vlog2.f32 %v450_v51  ;;  %vm1627_vm9 = vcmp.lt.f32.partialorder %v447_v50, 0.0004427343  ;;  %v1634_v3 = vadd.f32 1.0, %v1612_v47  ;;  %vm1638_vm12 = vcmp.lt.f32.partialorder %v456_v54, 0.0004427343 }
  0x40   : > { %760 = vxpose.xlu0.c.b16.end [8/8] (narrow) %v743_v7, 16  ;;  %1229 = vlog2.f32 %v459_v55  ;;  %v1636_v7 = vmul.f32 %v1200_v33, %v454_v53  ;;  %v1643_v9 = vadd.f32 1.0, %v1614_v52  ;;  %v463_v17 = vadd.f32 1.0, %v462_v59 }
  0x41   : > { %v1212_v0 = vpop.eup %1211  ;;  %1231 = vrcp.f32 %v450_v51  ;;  %v471_v18 = vmul.f32 -0.5, %v1612_v47  ;;  %vm1649_vm13 = vcmp.lt.f32.partialorder %v465_v63, 0.0004427343  ;;  %v480_v36 = vmul.f32 -0.5, %v1614_v52 }
  0x42   : > { %v1214_v4 = vpop.eup %1213  ;;  %v416_v5 = vmul.f32 0.6931472, %v1212_v0  ;;  %1233 = vrcp.f32 %v459_v55  ;;  %v474_v41 = vand.u32 2147483647, %v1612_v47  ;;  %v483_v2 = vand.u32 2147483647, %v1614_v52 }
  0x43   : > { %v1216_v14 = vpop.eup %1215  ;;  %v425_v16 = vmul.f32 0.6931472, %v1214_v4  ;;  %1235 = vlog2.f32 %v1634_v3  ;;  %v472_v54 = vadd.f32 1.0, %v471_v18  ;;  %v481_v59 = vadd.f32 1.0, %v480_v36 }
  0x44   : > { %v1218_v22 = vpop.eup %1217  ;;  %v422_v23 = vsel %vm1602_vm3, %v419_v57, %v416_v5  ;;  %v622_v24 = vsub.f32 1.0, %v1216_v14  ;;  %1237 = vlog2.f32 %v1643_v9  ;;  %vm1698_vm0 = vcmp.lt.f32.partialorder %v474_v41, 0.0004427343 }
  0x45   : > { %v1220_v28 = vpop.eup %1219  ;;  %v431_v30 = vsel %vm1606_vm4, %v428_v58, %v425_v16  ;;  %v558_v33 = vadd.f32 %v422_v23, %v398_v12  ;;  %v623_v35 = vsub.f32 1.0, %v1218_v22  ;;  %v482_v36 = vmul.f32 %v1614_v52, %v481_v59 }
  0x46   : > { %v1222_v37 = vpop.eup %1221  ;;  %v559_v39 = vadd.f32 %v431_v30, %v399_v13  ;;  %v1663_v40 = vsel %vm606_vm5, %v1216_v14, %v622_v24  ;;  %v434_v43 = vmul.f32 0.6931472, %v1220_v28  ;;  %v464_v13 = vmul.f32 %v1600_v38, %v463_v17 }
  0x47   : > { %v1224_v45 = vpop.eup %1223  ;;  %v656_v12 = vsel %vm655_vm6, %v558_v33, 0.0  ;;  %v639_v46 = vsel %vm607_vm7, %v1218_v22, %v623_v35  ;;  %v443_v49 = vmul.f32 0.6931472, %v1222_v37  ;;  %v473_v28 = vmul.f32 %v1612_v47, %v472_v54 }
  0x48   : > { %v1226_v50 = vpop.eup %1225  ;;  %v657_v10 = vsel %vm655_vm6, %v559_v39, 0.0  ;;  %v812_v51 = vpack.c.bf16 %v639_v46, %v1663_v40  ;;  %v440_v53 = vsel %vm1622_vm8, %v437_v61, %v434_v43  ;;  %v624_v0 = vsub.f32 1.0, %v1224_v45 }
  0x49   : > { %v1228_v55 = vpop.eup %1227  ;;  %v658_v57 = vadd.f32 %v657_v10, %v656_v12  ;;  %v449_v58 = vsel %vm1627_vm9, %v446_v1, %v443_v49  ;;  %v560_v11 = vadd.f32 %v440_v53, %v400_v21  ;;  %v625_v4 = vsub.f32 1.0, %v1226_v50  ;;  %v1727_v12 = vld [vmem:[%s1509_s21 + $0x58] sm:$0xff] }
  0x4a   : > { %v1230_v63 = vpop.eup %1229  ;;  %1096 = vmatpush3.bf16.msra.mxu1 %v812_v51  ;;  %v561_v38 = vadd.f32 %v449_v58, %v401_v27  ;;  %v452_v5 = vmul.f32 0.6931472, %v1228_v55  ;;  %v405_v1 = vmax.f32 %v1567_v42, 0.0  ;;  %v640_v27 = vsel %vm608_vm10, %v1224_v45, %v624_v0 }
  0x4b   : > { %v1232_v62 = vpop.eup %1231  ;;  %1097 = vmatprep.subr.bf16.mxu1 %v1387_v6  ;;  %v659_v61 = vsel %vm655_vm6, %v560_v11, 0.0  ;;  %v461_v14 = vmul.f32 0.6931472, %v1230_v63  ;;  %v1691_v18 = vsel %vm609_vm11, %v1226_v50, %v625_v4  ;;  %vm1711_vm1 = vcmp.lt.f32.partialorder %v483_v2, 0.0004427343  ;;  %v1756_v4 = vld [vmem:[%s1509_s21 + $0x60] sm:$0xff] }
  0x4c   : > { %v1234_v21 = vpop.eup %1233  ;;  %v660_v16 = vadd.f32 %v659_v61, %v658_v57  ;;  %v661_v17 = vsel %vm655_vm6, %v561_v38, 0.0  ;;  %v813_v23 = vpack.c.bf16 %v1691_v18, %v640_v27  ;;  %v458_v24 = vsel %vm1638_vm12, %v1636_v7, %v452_v5 }
  0x4d   : > { %v1236_v22 = vpop.eup %1235  ;;  %v467_v19 = vsel %vm1649_vm13, %v464_v13, %v461_v14  ;;  %v562_v35 = vadd.f32 %v458_v24, %v402_v29  ;;  %v626_v7 = vsub.f32 1.0, %v1232_v62  ;;  %v627_v8 = vsub.f32 1.0, %v1234_v21  ;;  %v1717_v29 = vld [vmem:[%s1509_s21 + $0x50] sm:$0xff]  ;;  %v1760_v14 = vld [vmem:[%s1509_s21 + $0x68] sm:$0xff] }
  0x4e   : > { %v1238_v15 = vpop.eup %1237  ;;  %v662_v33 = vadd.f32 %v661_v17, %v660_v16  ;;  %1098 = vmatpush3.bf16.msra.mxu1 %v813_v23  ;;  %v563_v47 = vadd.f32 %v467_v19, %v403_v31  ;;  %v470_v37 = vmul.f32 0.6931472, %v1236_v22  ;;  %1239 = vrcp.f32 %v1634_v3 }
  0x4f   : > { %1099 = vmatprep.subr.bf16.mxu1 %v1387_v6  ;;  %v663_v39 = vsel %vm655_vm6, %v562_v35, 0.0  ;;  %v479_v43 = vmul.f32 0.6931472, %v1238_v15  ;;  %v642_v31 = vsel %vm610_vm14, %v1232_v62, %v626_v7  ;;  %v1724_v45 = vsel %vm611_vm15, %v1234_v21, %v627_v8 }
  0x50   : > { %v664_v52 = vadd.f32 %v663_v39, %v662_v33  ;;  %v665_v41 = vsel %vm655_vm6, %v563_v47, 0.0  ;;  %v697_v49 = vsel %vm655_vm6, %v1663_v40, 0.0  ;;  %v698_v13 = vsel %vm655_vm6, %v639_v46, 0.0  ;;  %v1771_v33 = vld [vmem:[%s1509_s21 + $0x70] sm:$0xff] }
  0x51   : > { %v814_v3 = vpack.c.bf16 %v1724_v45, %v642_v31  ;;  %v476_v50 = vsel %vm1698_vm0, %v473_v28, %v470_v37  ;;  %v485_v20 = vsel %vm1711_vm1, %v482_v36, %v479_v43  ;;  %v344_v51 = vand.u32 2147483647, %v1717_v29 }
  0x52   : > { %v666_v10 = vadd.f32 %v665_v41, %v664_v52  ;;  %v564_v26 = vadd.f32 %v476_v50, %v404_v32  ;;  %v565_v53 = vadd.f32 %v485_v20, %v405_v1  ;;  %1241 = vrcp.f32 %v1643_v9 }
  0x53   : > { %1100 = vmatpush3.bf16.msra.mxu1 %v814_v3  ;;  %v486_v40 = vadd.f32 1.0, %v1617_v56  ;;  %v345_v46 = vand.u32 2147483647, %v1727_v12  ;;  %v699_v54 = vadd.f32 %v698_v13, %v697_v49  ;;  %v700_v55 = vsel %vm655_vm6, %v640_v27, 0.0 }
  0x54   : > { %1101 = vmatprep.subr.bf16.mxu1 %v1387_v6  ;;  %v667_v57 = vsel %vm655_vm6, %v564_v26, 0.0  ;;  %v495_v32 = vadd.f32 1.0, %v1620_v60  ;;  %v669_v11 = vsel %vm655_vm6, %v565_v53, 0.0  ;;  %v489_v9 = vmul.f32 -0.5, %v1617_v56 }
  0x55   : > { %v668_v58 = vadd.f32 %v667_v57, %v666_v10  ;;  %1243 = vlog2.f32 %v486_v40  ;;  %vm613_vm3 = vcmp.ge.f32.partialorder %v1567_v42, 0.0  ;;  %v406_v59 = vmax.f32 %v1572_v44, 0.0  ;;  %v1804_v57 = vld [vmem:[%s1509_s21 + $0x78] sm:$0xff] }
  0x56   : > { %1245 = vlog2.f32 %v495_v32  ;;  %v498_v38 = vmul.f32 -0.5, %v1620_v60  ;;  %v360_v0 = vsub.f32 0.0, %v344_v51  ;;  %v701_v5 = vadd.f32 %v700_v55, %v699_v54 }
  0x57   : > { %v1752_v63 = vadd.f32 %v669_v11, %v668_v58  ;;  %1247 = vrcp.f32 %v486_v40  ;;  %v407_v62 = vmax.f32 %v1575_v48, 0.0  ;;  %v361_v61 = vsub.f32 0.0, %v345_v46 }
  0x58   : > { %1249 = vrcp.f32 %v495_v32  ;;  %v1240_v1 = vpop.eup %1239  ;;  %v490_v2 = vadd.f32 1.0, %v489_v9  ;;  %v492_v21 = vand.u32 2147483647, %v1617_v56  ;;  %v386_v16 = vmul.f32 1.442695, %v360_v0 }
  0x59   : > { %v750_v17 = vpack.c.bf16 %v1727_v12, %v1717_v29  ;;  %v702_v27 = vsel %vm655_vm6, %v1691_v18, 0.0  ;;  %v628_v22 = vsub.f32 1.0, %v1240_v1  ;;  %v388_v23 = vmul.f32 1.442695, %v361_v61 }
  0x5a   : > { %v346_v24 = vand.u32 2147483647, %v1756_v4  ;;  %v499_v28 = vadd.f32 1.0, %v498_v38  ;;  %v501_v30 = vand.u32 2147483647, %v1620_v60  ;;  %1251 = vpow2.f32 %v386_v16 }
  0x5b   : > { %1086 = vmatpush3.bf16.msra.mxu0 %v750_v17  ;;  %v347_v15 = vand.u32 2147483647, %v1760_v14  ;;  %vm614_vm4 = vcmp.ge.f32.partialorder %v1572_v44, 0.0  ;;  %1253 = vpow2.f32 %v388_v23  ;;  %v751_v18 = vpack.c.bf16 %v1760_v14, %v1756_v4 }
  0x5c   : > { %1087 = vmatprep.subr.bf16.mxu0 %v1387_v6  ;;  %v362_v19 = vsub.f32 0.0, %v346_v24  ;;  %v1242_v35 = vpop.eup %1241  ;;  %v703_v36 = vadd.f32 %v702_v27, %v701_v5  ;;  %v704_v47 = vsel %vm655_vm6, %v642_v31, 0.0  ;;  %v491_v7 = vmul.f32 %v1617_v56, %v490_v2 }
  0x5d   : > { %v363_v8 = vsub.f32 0.0, %v347_v15  ;;  %v629_v37 = vsub.f32 1.0, %v1242_v35  ;;  %v644_v39 = vsel %vm612_vm2, %v1240_v1, %v628_v22  ;;  %v348_v25 = vand.u32 2147483647, %v1771_v33 }
  0x5e   : > { %v390_v43 = vmul.f32 1.442695, %v362_v19  ;;  %vm1782_vm5 = vcmp.lt.f32.partialorder %v492_v21, 0.0004427343  ;;  %v500_v49 = vmul.f32 %v1620_v60, %v499_v28  ;;  %vm1787_vm7 = vcmp.lt.f32.partialorder %v501_v30, 0.0004427343 }
  0x5f   : > { %v1244_v52 = vpop.eup %1243  ;;  %v392_v56 = vmul.f32 1.442695, %v363_v8  ;;  %1088 = vmatpush3.bf16.msra.mxu0 %v751_v18  ;;  %v645_v34 = vsel %vm613_vm3, %v1242_v35, %v629_v37  ;;  %v364_v50 = vsub.f32 0.0, %v348_v25  ;;  %vm615_vm8 = vcmp.ge.f32.partialorder %v1575_v48, 0.0 }
  0x60   : > { %v1246_v31 = vpop.eup %1245  ;;  %v488_v3 = vmul.f32 0.6931472, %v1244_v52  ;;  %1255 = vpow2.f32 %v390_v43  ;;  %1089 = vmatprep.subr.bf16.mxu0 %v1387_v6  ;;  %v815_v20 = vpack.c.bf16 %v645_v34, %v644_v39  ;;  %v705_v51 = vadd.f32 %v704_v47, %v703_v36 }
  0x61   : > { %v1248_v10 = vpop.eup %1247  ;;  %v497_v26 = vmul.f32 0.6931472, %v1246_v31  ;;  %1257 = vpow2.f32 %v392_v56  ;;  %v706_v53 = vsel %vm655_vm6, %v1724_v45, 0.0  ;;  %v394_v32 = vmul.f32 1.442695, %v364_v50 }
  0x62   : > { %v1250_v60 = vpop.eup %1249  ;;  %v494_v42 = vsel %vm1782_vm5, %v491_v7, %v488_v3  ;;  %v630_v40 = vsub.f32 1.0, %v1248_v10  ;;  %1102 = vmatpush3.bf16.msra.mxu1 %v815_v20  ;;  %v752_v11 = vpack.c.bf16 %v1804_v57, %v1771_v33  ;;  %v707_v5 = vadd.f32 %v706_v53, %v705_v51 }
  0x63   : > { %v503_v46 = vsel %vm1787_vm7, %v500_v49, %v497_v26  ;;  %v566_v54 = vadd.f32 %v494_v42, %v406_v59  ;;  %v631_v55 = vsub.f32 1.0, %v1250_v60  ;;  %1103 = vmatprep.subr.bf16.mxu1 %v1387_v6  ;;  %1259 = vpow2.f32 %v394_v32 }
  0x64   : > { %v567_v58 = vadd.f32 %v503_v46, %v407_v62  ;;  %v646_v45 = vsel %vm614_vm4, %v1248_v10, %v630_v40  ;;  %v1252_v9 = vpop.eup %1251  ;;  %v349_v62 = vand.u32 2147483647, %v1804_v57  ;;  %1090 = vmatpush3.bf16.msra.mxu0 %v752_v11  ;;  %v708_v44 = vsel %vm655_vm6, %v644_v39, 0.0 }
  0x65   : > { %v671_v38 = vsel %vm655_vm6, %v566_v54, 0.0  ;;  %v647_v0 = vsel %vm615_vm8, %v1250_v60, %v631_v55  ;;  %v1254_v59 = vpop.eup %1253  ;;  %v504_v21 = vadd.f32 1.0, %v1252_v9  ;;  %v709_v27 = vadd.f32 %v708_v44, %v707_v5 }
  0x66   : > { %v672_v61 = vadd.f32 %v671_v38, %v1752_v63  ;;  %v673_v1 = vsel %vm655_vm6, %v567_v58, 0.0  ;;  %v816_v2 = vpack.c.bf16 %v647_v0, %v646_v45  ;;  %v513_v17 = vadd.f32 1.0, %v1254_v59 }
  0x67   : > { %1261 = vlog2.f32 %v504_v21  ;;  %v507_v63 = vmul.f32 -0.5, %v1252_v9  ;;  %v365_v22 = vsub.f32 0.0, %v349_v62  ;;  %v710_v24 = vsel %vm655_vm6, %v645_v34, 0.0 }
  0x68   : > { %v1818_v16 = vadd.f32 %v673_v1, %v672_v61  ;;  %1104 = vmatpush3.bf16.msra.mxu1 %v816_v2  ;;  %1263 = vlog2.f32 %v513_v17  ;;  %v516_v30 = vmul.f32 -0.5, %v1254_v59  ;;  %v711_v19 = vadd.f32 %v710_v24, %v709_v27 }
  0x69   : > { %1105 = vmatprep.subr.bf16.mxu1 %v1387_v6  ;;  %1265 = vrcp.f32 %v504_v21  ;;  %v508_v18 = vadd.f32 1.0, %v507_v63  ;;  %v396_v35 = vmul.f32 1.442695, %v365_v22  ;;  %v712_v47 = vsel %vm655_vm6, %v646_v45, 0.0 }
  0x6a   : > { %v1820_v48 = vpop.eup %1255  ;;  %1267 = vrcp.f32 %v513_v17  ;;  %v510_v7 = vand.u32 2147483647, %v1252_v9  ;;  %v408_v37 = vmax.f32 %v1717_v29, 0.0  ;;  %v517_v39 = vadd.f32 1.0, %v516_v30 }
  0x6b   : > { %v1823_v23 = vpop.eup %1257  ;;  %v522_v28 = vadd.f32 1.0, %v1820_v48  ;;  %v525_v8 = vmul.f32 -0.5, %v1820_v48  ;;  %v409_v43 = vmax.f32 %v1727_v12, 0.0  ;;  %v519_v25 = vand.u32 2147483647, %v1254_v59 }
  0x6c   : > { %v531_v15 = vadd.f32 1.0, %v1823_v23  ;;  %vm616_vm9 = vcmp.ge.f32.partialorder %v1717_v29, 0.0  ;;  %v713_v41 = vadd.f32 %v712_v47, %v711_v19  ;;  %v509_v49 = vmul.f32 %v1252_v9, %v508_v18 }
  0x6d   : > { %1269 = vlog2.f32 %v522_v28  ;;  %v1828_v36 = vpop.eup %1259  ;;  %v534_v13 = vmul.f32 -0.5, %v1823_v23  ;;  %v714_v31 = vsel %vm655_vm6, %v647_v0, 0.0  ;;  %vm1838_vm10 = vcmp.lt.f32.partialorder %v510_v7, 0.0004427343 }
  0x6e   : > { %1271 = vrcp.f32 %v522_v28  ;;  %v540_v52 = vadd.f32 1.0, %v1828_v36  ;;  %v526_v3 = vadd.f32 1.0, %v525_v8  ;;  %v518_v20 = vmul.f32 %v1254_v59, %v517_v39 }
  0x6f   : > { %1273 = vlog2.f32 %v531_v15  ;;  %vm617_vm11 = vcmp.ge.f32.partialorder %v1727_v12, 0.0  ;;  %vm618_vm12 = vcmp.ge.f32.partialorder %v1756_v4, 0.0  ;;  %vm1844_vm13 = vcmp.lt.f32.partialorder %v519_v25, 0.0004427343 }
  0x70   : > { %1275 = vrcp.f32 %v531_v15  ;;  %v528_v53 = vand.u32 2147483647, %v1820_v48  ;;  %v715_v40 = vadd.f32 %v714_v31, %v713_v41  ;;  %v535_v55 = vadd.f32 1.0, %v534_v13 }
  0x71   : > { %1277 = vpow2.f32 %v396_v35  ;;  %v1262_v56 = vpop.eup %1261  ;;  %v527_v11 = vmul.f32 %v1820_v48, %v526_v3  ;;  %v543_v9 = vmul.f32 -0.5, %v1828_v36  ;;  %v537_v44 = vand.u32 2147483647, %v1823_v23 }
  0x72   : > { %1279 = vlog2.f32 %v540_v52  ;;  %v1264_v50 = vpop.eup %1263  ;;  %v506_v10 = vmul.f32 0.6931472, %v1262_v56  ;;  %vm1859_vm14 = vcmp.lt.f32.partialorder %v528_v53, 0.0004427343  ;;  %v410_v48 = vmax.f32 %v1756_v4, 0.0 }
  0x73   : > { %v1266_v26 = vpop.eup %1265  ;;  %v515_v60 = vmul.f32 0.6931472, %v1264_v50  ;;  %1281 = vrcp.f32 %v540_v52  ;;  %v536_v29 = vmul.f32 %v1823_v23, %v535_v55  ;;  %vm619_vm15 = vcmp.ge.f32.partialorder %v1760_v14, 0.0  ;;  %v654_v23 = vld [vmem:[#allocation4] sm:$0x1] }
  0x74   : > { %v1268_v42 = vpop.eup %1267  ;;  %v512_v46 = vsel %vm1838_vm10, %v509_v49, %v506_v10  ;;  %v632_v54 = vsub.f32 1.0, %v1266_v26  ;;  %v544_v19 = vadd.f32 1.0, %v543_v9  ;;  %vm1873_vm0 = vcmp.lt.f32.partialorder %v537_v44, 0.0004427343 }
  0x75   : > { %v568_v58 = vadd.f32 %v512_v46, %v408_v37  ;;  %v633_v45 = vsub.f32 1.0, %v1268_v42  ;;  %v521_v0 = vsel %vm1844_vm13, %v518_v20, %v515_v60  ;;  %v546_v7 = vand.u32 2147483647, %v1828_v36 }
  0x76   : > { %v648_v59 = vsel %vm616_vm9, %v1266_v26, %v632_v54  ;;  %v569_v27 = vadd.f32 %v521_v0, %v409_v43  ;;  %v411_v4 = vmax.f32 %v1760_v14, 0.0  ;;  %v545_v13 = vmul.f32 %v1828_v36, %v544_v19 }
  0x77   : > { %v1270_v32 = vpop.eup %1269  ;;  %v649_v1 = vsel %vm617_vm11, %v1268_v42, %v633_v45  ;;  %v716_v17 = vsel %vm655_vm6, %v648_v59, 0.0  ;;  %v675_v12 = vsel %vm655_vm6, %v568_v58, 0.0  ;;  %vm1886_vm1 = vcmp.lt.f32.partialorder %v546_v7, 0.0004427343 }
  0x78   : > { %v1272_v38 = vpop.eup %1271  ;;  %v524_v5 = vmul.f32 0.6931472, %v1270_v32  ;;  %v817_v63 = vpack.c.bf16 %v649_v1, %v648_v59  ;;  %v717_v35 = vadd.f32 %v716_v17, %v715_v40  ;;  %v676_v8 = vadd.f32 %v675_v12, %v1818_v16 }
  0x79   : > { %v1274_v61 = vpop.eup %1273  ;;  %v634_v2 = vsub.f32 1.0, %v1272_v38  ;;  %v718_v37 = vsel %vm655_vm6, %v649_v1, 0.0  ;;  %v677_v39 = vsel %vm655_vm6, %v569_v27, 0.0  ;;  %v412_v36 = vmax.f32 %v1771_v33, 0.0 }
  0x7a   : > { %v1276_v21 = vpop.eup %1275  ;;  %v530_v28 = vsel %vm1859_vm14, %v527_v11, %v524_v5  ;;  %v533_v30 = vmul.f32 0.6931472, %v1274_v61  ;;  %1106 = vmatpush3.bf16.msra.mxu1 %v817_v63  ;;  %v719_v56 = vadd.f32 %v718_v37, %v717_v35  ;;  %v678_v14 = vadd.f32 %v677_v39, %v676_v8  ;;  %v696_v35 = vld [vmem:[#allocation5] sm:$0x1] }
  0x7b   : > { %v635_v22 = vsub.f32 1.0, %v1276_v21  ;;  %v1278_v24 = vpop.eup %1277  ;;  %v650_v15 = vsel %vm618_vm12, %v1272_v38, %v634_v2  ;;  %1107 = vmatprep.subr.bf16.mxu1 %v1387_v6  ;;  %v570_v43 = vadd.f32 %v530_v28, %v410_v48  ;;  %vm620_vm2 = vcmp.ge.f32.partialorder %v1771_v33, 0.0 }
  0x7c   : > { %v1280_v18 = vpop.eup %1279  ;;  %v549_v52 = vadd.f32 1.0, %v1278_v24  ;;  %v539_v41 = vsel %vm1873_vm0, %v536_v29, %v533_v30  ;;  %v720_v34 = vsel %vm655_vm6, %v650_v15, 0.0  ;;  %v552_v3 = vmul.f32 -0.5, %v1278_v24 }
  0x7d   : > { %v651_v47 = vsel %vm619_vm15, %v1276_v21, %v635_v22  ;;  %v542_v49 = vmul.f32 0.6931472, %v1280_v18  ;;  %v1282_v31 = vpop.eup %1281  ;;  %v571_v50 = vadd.f32 %v539_v41, %v411_v4  ;;  %v679_v10 = vsel %vm655_vm6, %v570_v43, 0.0  ;;  %v744_v4 = vld [vmem:[#allocation2] sm:$0xff] }
  0x7e   : > { %v818_v25 = vpack.c.bf16 %v651_v47, %v650_v15  ;;  %1283 = vlog2.f32 %v549_v52  ;;  %v721_v26 = vadd.f32 %v720_v34, %v719_v56  ;;  %v636_v60 = vsub.f32 1.0, %v1282_v31  ;;  %v876_v34 = vld [vmem:[%s1504_s30] sm:$0xff] (!%p1050_p1) }
  0x7f   : > { %1285 = vrcp.f32 %v549_v52  ;;  %v548_v20 = vsel %vm1886_vm1, %v545_v13, %v542_v49  ;;  %v680_v51 = vadd.f32 %v679_v10, %v678_v14  ;;  %v722_v53 = vsel %vm655_vm6, %v651_v47, 0.0  ;;  %v811_v49 = vld [vmem:[#allocation3] sm:$0xff] }
  0x80   : > { %1108 = vmatpush3.bf16.msra.mxu1 %v818_v25  ;;  %v553_v42 = vadd.f32 1.0, %v552_v3  ;;  %v555_v46 = vand.u32 2147483647, %v1278_v24  ;;  %v572_v54 = vadd.f32 %v548_v20, %v412_v36  ;;  %v723_v55 = vadd.f32 %v722_v53, %v721_v26  ;;  %v896_v53 = vld [vmem:[%s266_s12] sm:$0x1] (!%p1050_p1) }
  0x81   : > { %1109 = vmatprep.subr.bf16.mxu1 %v1387_v6  ;;  %v681_v6 = vsel %vm655_vm6, %v571_v50, 0.0  ;;  %v652_v32 = vsel %vm620_vm2, %v1282_v31, %v636_v60  ;;  %v413_v38 = vmax.f32 %v1804_v57, 0.0  ;;  %vm621_vm4 = vcmp.ge.f32.partialorder %v1804_v57, 0.0 }
  0x82   : > { %v682_v58 = vadd.f32 %v681_v6, %v680_v51  ;;  %v554_v45 = vmul.f32 %v1278_v24, %v553_v42  ;;  %v724_v11 = vsel %vm655_vm6, %v652_v32, 0.0  ;;  %vm556_vm3 = vcmp.lt.f32.partialorder %v555_v46, 0.0004427343 }
  0x83   : > { %v683_v0 = vsel %vm655_vm6, %v572_v54, 0.0  ;;  %v725_v61 = vadd.f32 %v724_v11, %v723_v55  ;;  %vm694_vm5 = vcmask 122880   ;;  %v1389_v3 = vmov (!%p1050_p1), 0  }
  0x84   : > { %v684_v62 = vadd.f32 %v683_v0, %v682_v58  ;;  %1287 = vset.pattern.permute.xlu0 (!%p1050_p1), %v1389_v3  ;;  %v900_v20 = vlaneseq (!%p1050_p1)  ;;  %v897_v46 = vmul.f32 (!%p1050_p1), 2.0, %v896_v53 }
  0x85   : > { %885 = vperm.xlu0 (!%p1050_p1), %1287, %v876_v34  }
  0x86   : > { %v901_v51 = vshrl.u32 (!%p1050_p1), %v900_v20, 7 }
  0x88   : > { %v1284_v9 = vpop.eup %1283  ;;  %v902_v54 = vsub.s32 (!%p1050_p1), 0, %v901_v51 }
  0x89   : > { %v1286_v59 = vpop.eup %1285  ;;  %v551_v33 = vmul.f32 0.6931472, %v1284_v9 }
  0x8a   : > { %v761_v40 = vpop.trf.xlu0  ;;  %v637_v5 = vsub.f32 1.0, %v1286_v59  ;;  %v903_v58 = vrot.slane (!%p1050_p1), %v897_v46, %v902_v54 }
  0x8b   : > { %1092 = vmatmul.mubr.bf16.vlgmr.msra.gmra.mrb[0].mxu0 %v761_v40  ;;  %v557_v1 = vsel %vm556_vm3, %v554_v45, %v551_v33 }
  0x8c   : > { %v573_v44 = vadd.f32 %v557_v1, %v413_v38  ;;  %v653_v2 = vsel %vm621_vm4, %v1286_v59, %v637_v5 }
  0x8d   : > { %v726_v21 = vsel %vm655_vm6, %v653_v2, 0.0  ;;  %v819_v17 = vpack.c.bf16 %v653_v2, %v652_v32 }
  0x8e   : > { %v685_v48 = vsel %vm655_vm6, %v573_v44, 0.0  ;;  %v727_v29 = vadd.f32 %v726_v21, %v725_v61 }
  0x8f   : > { %v686_v27 = vadd.f32 %v685_v48, %v684_v62  ;;  %1110 = vmatpush3.bf16.msra.mxu1 %v819_v17 }
  0x90   : > { %v728_v12 = vrot.slane %v727_v29, 4 }
  0x91   : > { %v687_v63 = vrot.slane %v686_v27, 4 }
  0x92   : > { %v729_v22 = vadd.f32 %v728_v12, %v727_v29  ;;  %1112 = vmatmul.mubr.bf16.vlgmr.msra.gmra.mrb[0].mxu1 %v761_v40 }
  0x93   : > { %v688_v24 = vadd.f32 %v687_v63, %v686_v27 }
  0x94   : > { %v730_v57 = vrot.slane %v729_v22, 2 }
  0x95   : > { %v689_v28 = vrot.slane %v688_v24, 2 }
  0x96   : > { %v731_v30 = vadd.f32 %v730_v57, %v729_v22 }
  0x97   : > { %v690_v15 = vadd.f32 %v689_v28, %v688_v24 }
  0x98   : > { %v732_v19 = vrot.slane %v731_v30, 1 }
  0x99   : > { %v691_v18 = vrot.slane %v690_v15, 1 }
  0x9a   : > { %v733_v47 = vadd.f32 %v732_v19, %v731_v30 }
  0x9b   : > { %v692_v7 = vadd.f32 %v691_v18, %v690_v15 }
  0x9c   : > { %v734_v8 = vadd.f32 %v733_v47, %v696_v35 }
  0x9d   : > { %v693_v37 = vadd.f32 %v692_v7, %v654_v23 }
  0x9e   : > { %735 = vst.msk [vmem:[#allocation5] sm:$0x1] %vm694_vm5, %v734_v8 }
  0x9f   : > { %695 = vst.msk [vmem:[#allocation4] sm:$0x1] %vm694_vm5, %v693_v37 }
  0xa5   : > { %v1052_v50 = vld [vmem:[#allocation5] ss:$0 sm:$0xff] (!%p1050_p1) }
  0xa6   : > { %v1051_v42 = vld [vmem:[#allocation4] ss:$0 sm:$0xff] (!%p1050_p1) }
 0x104   : > { %v886_v10 = vpop.permute.xlu0 (!%p1050_p1), %885 }
 0x105   : > { %v888_v36 = vadd.f32 (!%p1050_p1), %v1052_v50, %v886_v10 }
 0x107   : > { %v889_v26 = vadd.f32 (!%p1050_p1), 1.0, %v888_v36 }
 0x109   : > { %1288 = vrcp.f32 (!%p1050_p1), %v889_v26 }
 0x113   : > { %v1289_v11 = vpop.eup (!%p1050_p1), %1288 }
 0x15e   : > { %v803_v39 = vpop.f32.mrb[0].mxu0 }
 0x15f   : > { %v809_v43 = vadd.f32 %v803_v39, %v744_v4  ;;  %v1093_v25 = vpop.f32.mrb[1].mxu0 }
 0x160   : > { %v806_v52 = vpop.f32.mrb[2].mxu0 }
 0x161   : > { %810 = vst.msk [vmem:[#allocation2] sm:$0xff] %vm655_vm6, %v809_v43  ;;  %v1094_v41 = vpop.f32.mrb[3].mxu0 }
 0x162   : > { %865 = sbr.rel (%p1050_p1) target bundleno = 381 (0x17d), region = 44 }
 0x165   : > { %v854_v13 = vpop.f32.mrb[0].mxu1 }
 0x166   : > { %v860_v56 = vadd.f32 %v854_v13, %v811_v49  ;;  %v1113_v16 = vpop.f32.mrb[1].mxu1 }
 0x167   : > { %v857_v31 = vpop.f32.mrb[2].mxu1 }
 0x168   : > { %861 = vst.msk [vmem:[#allocation3] sm:$0xff] %vm655_vm6, %v860_v56  ;;  %v1114_v14 = vpop.f32.mrb[3].mxu1  ;;  %v867_v40 = vld [vmem:[#allocation2] sm:$0xff] (!%p1050_p1) }
 0x169   : > { %v874_v55 = vsub.f32 %v1051_v42, %v867_v40 }
 0x16b   : > { %v898_v45 = vmul.f32 0.013020833, %v874_v55 }
 0x16d   : > { %v905_v0 = vadd.f32 %v903_v58, %v898_v45 }
 0x16f   : > { %v890_v60 = vld [vmem:[#allocation3] sm:$0xff] }
 0x170   : > { %v891_v6 = vmul.f32 2.0, %v890_v60 }
 0x172   : > { %v892_v32 = vadd.f32 1.0, %v891_v6 }
 0x174   : > { %v894_v9 = vmul.f32 %v1289_v11, %v892_v32 }
 0x176   : > { %v895_v38 = vsub.f32 1.0, %v894_v9 }
 0x178   : > { %v906_v59 = vmul.f32 2.0, %v895_v38 }
 0x17a   : > { %v907_v33 = vadd.f32 %v906_v59, %v905_v0 }
 0x17c   : > { %908 = vst.msk [vmem:[%s263_s10] sm:$0xff] %vm655_vm6, %v907_v33 }
 0x17d PF: > { %s1054_s18 = sshll.u32 %s1372_s19, 7  ;;  %s923_s5 = sshll.u32 %s263_s10, 4  ;;  %s924_s5 = int_to_ptr.vmem [resolvable:$true] %s923_s5 }
 0x17e   : > { %s1921_s26 = scalar_lea.hbm %s1976_s4, %s1054_s18  ;;  %s2020_s6 = sand.u32 1, %s1360_s16  }
 0x17f   : > { %s910_s8 = scalar_lea.sflag [#allocation7], %s2020_s6  ;;  %s1290_s9 = scalar_lea.vmem %s924_s5, 128 }
 0x180   : > { %p1291_p2 = scmp.ne.s32.totalorder %s924_s5, %s1290_s9  ;;  %s1390_s11 = smov [#allocation6]  }
 0x181   : > { %s1294_s12 = sshll.u32 %s1390_s11, 4  ;;  %s1295_s12 = int_to_ptr.vmem [resolvable:$false] %s1294_s12 }
 0x182   : > { %p1292_p4 = pnand %p1291_p2, %p1465_p3  ;;  %s1296_s13 = scalar_lea.vmem %s1295_s12, 256 }
 0x183   : > { %p1297_p6 = scmp.lt.s32.totalorder %s924_s5, %s1295_s12  ;;  %p1298_p7 = scmp.lt.s32.totalorder %s1296_s13, %s1290_s9 }
 0x184   : > { %p1293_p5 = pneg %p1292_p4 }
 0x185   : > { %p1299_p8 = por %p1298_p7, %p1297_p6 }
 0x187   : > { %p1300_p10 = pnand %p1299_p8, %p1293_p5 }
 0x189   : > { %1303 = shalt.err (!%p1300_p10)
}
 0x18a   : > { %s1304_s19 = scalar_lea.hbm %s1921_s26, 128  ;;  %s1308_s23 = scalar_lea.hbm %s1976_s4, 256 }
 0x18b   : > { %p1305_p11 = scmp.ne.s32.totalorder %s1921_s26, %s1304_s19  ;;  %p1309_p0 = scmp.lt.u32.totalorder %s1921_s26, %s1976_s4 }
 0x18c   : > { %p1310_p1 = scmp.lt.u32.totalorder %s1308_s23, %s1304_s19  ;;  %p1312_p4 = scmp.lt.u32.totalorder %s1304_s19, %s1921_s26 }
 0x18d   : > { %p1306_p12 = pnand %p1305_p11, %p1465_p3 }
 0x18e   : > { %p1311_p2 = por %p1310_p1, %p1309_p0 }
 0x18f   : > { %p1307_p13 = pneg %p1306_p12 }
 0x190   : > { %p1313_p5 = por %p1312_p4, %p1311_p2 }
 0x192   : > { %p1314_p6 = pnand %p1313_p5, %p1307_p13 }
 0x194   : > { %1317 = shalt.err (!%p1314_p6)
}
 0x195   : > { %1116 = dma.vmem_to_hbm [thread:$0]  (%p1465_p3), %s924_s5, 128, %s1921_s26, %s910_s8  }
 0x196 PF: > { %p1122_p7 = scmp.ge.s32.totalorder %s1384_s22, 2  ;;  %s935_s30 = sand.u32 1, %s1356_s15  }
 0x197   : > { %s936_s10 = scalar_lea.sflag [#allocation7], %s935_s30 }
 0x198   : > { %p1119_p8 = pnand %p1122_p7, %p1475_p9 }
 0x19a   : > { %1351 = dma.done.wait (!%p1119_p8), %s936_s10, 128  }
 0x19b   : > { %1353 = vsyncadd (!%p1119_p8), %s936_s10, 4294967168  ;;  %s17_s22 = sadd.s32 1, %s1384_s22   ;;  %s2021_s17 = sld [smem:[#allocation9_spill]] }
 0x19c   : > { %p14_p10 = scmp.ge.s32.totalorder %s17_s22, 8   ;;  %s2022_s20 = sld [smem:[#allocation14_spill]] }
 0x19d   : > { %s2023_s18 = sld [smem:[#allocation10_spill]]  ;;  %s2024_s19 = sld [smem:[#allocation11_spill]] }
 0x19e   : > { %s2025_s27 = sld [smem:[#allocation12_spill]]  ;;  %s2026_s21 = sld [smem:[#allocation13_spill]] }
 0x19f   : > { %s2027_s15 = smov %s1360_s16  ;;  %16 = sbr.rel (!%p14_p10) target bundleno = 5 (0x5), region = 88 }
 0x1a1   : > { %s2028_s16 = smov %s2021_s17 }
 0x1a2   : > { %s2029_s17 = smov %s2022_s20 }
 0x1a4   : > { %s2030_s20 = smov %s2025_s27 }
 0x1a6   :  { %941 = vsyncpa [#allocation7], 1 }
 0x1a7   :  { %943 = vsyncpa [#allocation7 + $0x1], 1 }

</bundles_post_ra>
